<compile_context>
chip_gen: v7x
topology: tpu7x:2x2x1
jax: 0.10.0
libtpu: 0.0.40
codegen_flags: <defaults>
</compile_context>

<pallas_src>
import functools

import jax
import jax.numpy as jnp
from jax.experimental import pallas as pl
from jax.experimental.pallas import tpu as pltpu


def _temporal_attn_kernel(x_ref, mask_ref, wqkv_ref, bqkv_ref, wo_ref, bo_ref,
                          gamma_ref, beta_ref, out_ref, *,
                          heads, head_dim, seq_len, batch_tile, use_bf16):
    """One grid step = `batch_tile` batch elements flattened into T = batch_tile*S tokens.
    Fused QKV projection, head-batched attention with key-padding mask, output projection,
    residual + LayerNorm, all inside the kernel."""
    D = heads * head_dim
    S = seq_len
    T = batch_tile * S
    mm_dtype = jnp.bfloat16 if use_bf16 else jnp.float32

    x = x_ref[0]                                         # (T, D)  token-major, f32
    x_t = x.T                                            # (D, T)  feature-major

    # Fused in-projection: one (3D, D) @ (D, T) MXU matmul; rows are [Q | K | V]
    # (scale 1/sqrt(hd) already folded into the Q rows in the wrapper).
    qkv_t = jnp.dot(wqkv_ref[...], x_t.astype(mm_dtype),
                    preferred_element_type=jnp.float32) + bqkv_ref[...]      # (3D, T)

    # Head split: sublane slice + leading-dim reshape (layout-preserving when
    # head_dim % 8 == 0) — no lane-crossing reshapes.
    q_h = qkv_t[:D, :].reshape(heads, head_dim, T)        # (H, hd, T)
    k_h = qkv_t[D:2 * D, :].reshape(heads, head_dim, T)   # (H, hd, T)
    v_h = qkv_t[2 * D:, :].reshape(heads, head_dim, T)    # (H, hd, T)
    q_ht = jnp.swapaxes(q_h, 1, 2)                        # (H, T, hd)

    # Head-batched score matmul.
    s = jnp.einsum('hqd,hdk->hqk', q_ht.astype(mm_dtype), k_h.astype(mm_dtype),
                   preferred_element_type=jnp.float32)    # (H, T, T)

    # key_padding_mask: invalid keys get a very large negative logit.
    # (Fully-masked rows give uniform attention instead of PyTorch's NaN; documented.)
    valid = mask_ref[0]                                   # (1, T), 1.0 = valid key
    s = s + jnp.where(valid > 0.5, 0.0, -1e30)[None, :, :]
    if batch_tile > 1:
        # Multiple batch elements share this token tile: block-diagonal mask so
        # queries only attend within their own sequence.
        qi = jax.lax.broadcasted_iota(jnp.int32, (T, T), 0) // S
        ki = jax.lax.broadcasted_iota(jnp.int32, (T, T), 1) // S
        s = s + jnp.where(qi == ki, 0.0, -1e30)[None, :, :]

    s_max = jnp.max(s, axis=-1, keepdims=True)
    p = jnp.exp(s - s_max)                                # f32 exp (EUP)
    denom = jnp.sum(p, axis=-1, keepdims=True)
    p = p * pl.reciprocal(denom, approx=True)             # EUP divide

    # Context produced feature-major so heads merge back with a layout-preserving reshape.
    ctx_t = jnp.einsum('hdk,hqk->hdq', v_h.astype(mm_dtype), p.astype(mm_dtype),
                       preferred_element_type=jnp.float32)   # (H, hd, T)
    ctx = ctx_t.reshape(D, T).T                              # (T, D)

    attn_out = jnp.dot(ctx.astype(mm_dtype), wo_ref[...],
                       preferred_element_type=jnp.float32) + bo_ref[...]     # (T, D)

    # Residual + LayerNorm over the embed dim (PyTorch LayerNorm, eps=1e-5), in f32.
    y = x + attn_out
    mu = jnp.mean(y, axis=-1, keepdims=True)
    var = jnp.mean((y - mu) * (y - mu), axis=-1, keepdims=True)
    out = (y - mu) * jax.lax.rsqrt(var + 1e-5) * gamma_ref[...] + beta_ref[...]
    out_ref[0] = out.astype(out_ref.dtype)


def _pick_batch_tile(B, S, D, heads, *, budget_bytes=8 * 1024 * 1024):
    """VMEM-aware batch tile: largest bt whose live footprint (dominated by the
    (heads, T, T) scores) fits a conservative budget, while keeping >= 2 grid steps
    so the second TensorCore on v7x has work."""
    best = 1
    for cand in range(1, B + 1):
        if B % cand != 0:
            continue
        if B >= 2 and B // cand < 2:
            continue
        T = cand * S
        live = (heads * T * T * 4 * 2      # scores + probabilities (f32)
                + T * 3 * D * 4 * 2        # fused qkv (both orientations)
                + 4 * T * D * 4)           # double-buffered x / out blocks
        if live <= budget_bytes:
            best = cand
    return best


def temporal_attn(x, mask, params, *, heads, batch_tile=None, use_bf16=False):
    B, S, D = x.shape
    head_dim = D // heads
    assert head_dim * heads == D

    if batch_tile is None:
        batch_tile = _pick_batch_tile(B, S, D, heads)
    assert B % batch_tile == 0
    G = B // batch_tile
    T = batch_tile * S

    # PyTorch MultiheadAttention packs q/k/v in in_proj_weight (3D, D); we keep it
    # row-major (feature-major matmul) and fold 1/sqrt(head_dim) into the Q rows.
    scale = 1.0 / (float(head_dim) ** 0.5)
    qkv_scale = jnp.concatenate([jnp.full((D,), scale, jnp.float32),
                                 jnp.ones((2 * D,), jnp.float32)])
    w_qkv = params["in_proj_weight"].astype(jnp.float32) * qkv_scale[:, None]   # (3D, D)
    b_qkv = (params["in_proj_bias"].astype(jnp.float32) * qkv_scale).reshape(3 * D, 1)
    wo_t = params["out_proj_weight"].astype(jnp.float32).T                      # (D, D)
    bo = params["out_proj_bias"].astype(jnp.float32).reshape(1, D)
    gamma = params["ln_weight"].astype(jnp.float32).reshape(1, D)
    beta = params["ln_bias"].astype(jnp.float32).reshape(1, D)

    if use_bf16:
        # bf16 MXU path (v6e/v7x): halves weight DMA bytes; accumulation stays f32.
        w_qkv = w_qkv.astype(jnp.bfloat16)
        wo_t = wo_t.astype(jnp.bfloat16)

    # Group bt batch elements per grid step in HBM layout (free, contiguous reshape).
    x_g = x.reshape(G, T, D)
    mask_g = mask.astype(jnp.float32).reshape(G, 1, T)

    kernel = functools.partial(_temporal_attn_kernel, heads=heads, head_dim=head_dim,
                               seq_len=S, batch_tile=batch_tile, use_bf16=use_bf16)

    # Explicit scoped-VMEM limit (default 16/32 MiB is the real ceiling, not physical
    # VMEM); capped with headroom under v7x's 64 MiB.
    live_est = (heads * T * T * 4 * 2 + T * 3 * D * 4 * 2 + 4 * T * D * 4
                + 2 * (3 * D * D + D * D) * (2 if use_bf16 else 4))
    vmem_limit = int(min(max(2 * live_est, 32 * 1024 * 1024), 50 * 1024 * 1024))

    out = pl.pallas_call(
        kernel,
        out_shape=jax.ShapeDtypeStruct((G, T, D), x.dtype),
        grid=(G,),
        in_specs=[
            pl.BlockSpec((1, T, D), lambda i: (i, 0, 0)),      # x tokens
            pl.BlockSpec((1, 1, T), lambda i: (i, 0, 0)),      # key-validity mask
            pl.BlockSpec((3 * D, D), lambda i: (0, 0)),        # packed [Wq*s | Wk | Wv]
            pl.BlockSpec((3 * D, 1), lambda i: (0, 0)),        # packed [bq*s | bk | bv]
            pl.BlockSpec((D, D), lambda i: (0, 0)),            # Wo^T
            pl.BlockSpec((1, D), lambda i: (0, 0)),            # bo
            pl.BlockSpec((1, D), lambda i: (0, 0)),            # ln gamma
            pl.BlockSpec((1, D), lambda i: (0, 0)),            # ln beta
        ],
        out_specs=pl.BlockSpec((1, T, D), lambda i: (i, 0, 0)),
        compiler_params=pltpu.CompilerParams(
            dimension_semantics=("parallel",),
            vmem_limit_bytes=vmem_limit),
    )(x_g, mask_g, w_qkv, b_qkv, wo_t, bo, gamma, beta)

    return out.reshape(B, S, D)


def _reference(x, mask, params, *, heads):
    """Plain-JAX reference matching PyTorch MultiheadAttention eval semantics."""
    B, S, D = x.shape
    hd = D // heads
    wq, wk, wv = (params["in_proj_weight"][i * D:(i + 1) * D] for i in range(3))
    bq, bk, bv = (params["in_proj_bias"][i * D:(i + 1) * D] for i in range(3))
    q = x @ wq.T + bq
    k = x @ wk.T + bk
    v = x @ wv.T + bv
    q = q.reshape(B, S, heads, hd).transpose(0, 2, 1, 3)
    k = k.reshape(B, S, heads, hd).transpose(0, 2, 1, 3)
    v = v.reshape(B, S, heads, hd).transpose(0, 2, 1, 3)
    s = jnp.einsum("bhqd,bhkd->bhqk", q, k) / jnp.sqrt(jnp.float32(hd))
    key_bias = jnp.where(mask[:, None, None, :] > 0.5, 0.0, -1e30)
    p = jax.nn.softmax(s + key_bias, axis=-1)
    ctx = jnp.einsum("bhqk,bhkd->bhqd", p, v).transpose(0, 2, 1, 3).reshape(B, S, D)
    attn_out = ctx @ params["out_proj_weight"].T + params["out_proj_bias"]
    y = x + attn_out
    mu = jnp.mean(y, axis=-1, keepdims=True)
    var = jnp.mean((y - mu) ** 2, axis=-1, keepdims=True)
    return ((y - mu) / jnp.sqrt(var + 1e-5)) * params["ln_weight"] + params["ln_bias"]


if __name__ == "__main__":
    B, S, D, heads = 2, 8, 32, 4

    key = jax.random.PRNGKey(0)
    kx, kw1, kw2, kb1 = jax.random.split(key, 4)

    x = jax.random.normal(kx, (B, S, D), dtype=jnp.float32)
    # mask: 1.0 = valid token, 0.0 = padding (batch 0 fully valid, batch 1 has 5 valid)
    lengths = jnp.array([S, 5])
    mask = (jnp.arange(S)[None, :] < lengths[:, None]).astype(jnp.float32)

    params = {
        "in_proj_weight": 0.05 * jax.random.normal(kw1, (3 * D, D), dtype=jnp.float32),
        "in_proj_bias": 0.01 * jax.random.normal(kb1, (3 * D,), dtype=jnp.float32),
        "out_proj_weight": 0.05 * jax.random.normal(kw2, (D, D), dtype=jnp.float32),
        "out_proj_bias": jnp.zeros((D,), dtype=jnp.float32),
        "ln_weight": jnp.ones((D,), dtype=jnp.float32),
        "ln_bias": jnp.zeros((D,), dtype=jnp.float32),
    }

    ref = _reference(x, mask, params, heads=heads)

    # f32 path (default): tolerance accounts for the EUP approximate reciprocal.
    out = jax.block_until_ready(temporal_attn(x, mask, params, heads=heads))
    assert out.shape == (B, S, D)
    assert jnp.allclose(out, ref, rtol=2e-3, atol=2e-3), "f32 kernel mismatch vs. JAX reference"

    # bf16 MXU path (v6e/v7x option): looser tolerance for bf16 rounding.
    out_bf16 = jax.block_until_ready(
        temporal_attn(x, mask, params, heads=heads, use_bf16=True))
    assert jnp.allclose(out_bf16, ref, rtol=5e-2, atol=5e-2), "bf16 kernel mismatch vs. JAX reference"

    print("KERNEL_OK")
</pallas_src>

<mosaic_0001>
module attributes {stable_mosaic.version = 11 : i64} {
  func.func @_temporal_attn_kernel(%arg0: i32, %arg1: memref<1x8x32xf32, #tpu.memory_space<vmem>>, %arg2: memref<1x1x8xf32, #tpu.memory_space<vmem>>, %arg3: memref<96x32xf32, #tpu.memory_space<vmem>>, %arg4: memref<96x1xf32, #tpu.memory_space<vmem>>, %arg5: memref<32x32xf32, #tpu.memory_space<vmem>>, %arg6: memref<1x32xf32, #tpu.memory_space<vmem>>, %arg7: memref<1x32xf32, #tpu.memory_space<vmem>>, %arg8: memref<1x32xf32, #tpu.memory_space<vmem>>, %arg9: memref<1x8x32xf32, #tpu.memory_space<vmem>>) attributes {dimension_semantics = [#tpu.dimension_semantics<parallel>], iteration_bounds = array<i64: 2>, scalar_prefetch = 0 : i64, scratch_operands = 0 : i64, tpu.core_type = #tpu.core_type<tc>, window_params = [{transform_indices = @transform_0, window_bounds = array<i64: 1, 8, 32>}, {transform_indices = @transform_1, window_bounds = array<i64: 1, 1, 8>}, {pipeline_mode = #tpu.pipeline_mode<synchronous>, transform_indices = @transform_2, window_bounds = array<i64: 96, 32>}, {pipeline_mode = #tpu.pipeline_mode<synchronous>, transform_indices = @transform_3, window_bounds = array<i64: 96, 1>}, {pipeline_mode = #tpu.pipeline_mode<synchronous>, transform_indices = @transform_4, window_bounds = array<i64: 32, 32>}, {pipeline_mode = #tpu.pipeline_mode<synchronous>, transform_indices = @transform_5, window_bounds = array<i64: 1, 32>}, {pipeline_mode = #tpu.pipeline_mode<synchronous>, transform_indices = @transform_6, window_bounds = array<i64: 1, 32>}, {pipeline_mode = #tpu.pipeline_mode<synchronous>, transform_indices = @transform_7, window_bounds = array<i64: 1, 32>}, {transform_indices = @transform_8, window_bounds = array<i64: 1, 8, 32>}]} {
    %c0 = arith.constant 0 : index
    %c0_0 = arith.constant 0 : index
    %c0_1 = arith.constant 0 : index
    %0 = vector.load %arg1[%c0, %c0_0, %c0_1] : memref<1x8x32xf32, #tpu.memory_space<vmem>>, vector<1x8x32xf32>
    %1 = vector.shape_cast %0 : vector<1x8x32xf32> to vector<8x32xf32>
    %2 = tpu.transpose %1, [1, 0] : vector<8x32xf32> -> vector<32x8xf32>
    %c0_2 = arith.constant 0 : index
    %c0_3 = arith.constant 0 : index
    %3 = vector.load %arg3[%c0_2, %c0_3] : memref<96x32xf32, #tpu.memory_space<vmem>>, vector<96x32xf32>
    %cst = arith.constant dense<0.000000e+00> : vector<96x8xf32>
    %4 = tpu.matmul %3, %2, %cst {dimension_numbers = #tpu.dot_dimension_numbers<[1], [0], [0], [1], [0, 0, 1, 1], [], []>} : vector<96x32xf32>, vector<32x8xf32>, vector<96x8xf32> -> vector<96x8xf32>
    %c0_4 = arith.constant 0 : index
    %c0_5 = arith.constant 0 : index
    %5 = vector.load %arg4[%c0_4, %c0_5] : memref<96x1xf32, #tpu.memory_space<vmem>>, vector<96x1xf32>
    %6 = vector.broadcast %5 : vector<96x1xf32> to vector<96x8xf32>
    %7 = arith.addf %4, %6 : vector<96x8xf32>
    %8 = vector.extract_strided_slice %7 {offsets = [0, 0], sizes = [32, 8], strides = [1, 1]} : vector<96x8xf32> to vector<32x8xf32>
    %9 = vector.shape_cast %8 : vector<32x8xf32> to vector<4x8x8xf32>
    %10 = vector.extract_strided_slice %7 {offsets = [32, 0], sizes = [32, 8], strides = [1, 1]} : vector<96x8xf32> to vector<32x8xf32>
    %11 = vector.shape_cast %10 : vector<32x8xf32> to vector<4x8x8xf32>
    %12 = vector.extract_strided_slice %7 {offsets = [64, 0], sizes = [32, 8], strides = [1, 1]} : vector<96x8xf32> to vector<32x8xf32>
    %13 = vector.shape_cast %12 : vector<32x8xf32> to vector<4x8x8xf32>
    %14 = tpu.transpose %9, [0, 2, 1] : vector<4x8x8xf32> -> vector<4x8x8xf32>
    "tpu.trace_start"() <{level = 10 : i32, message = "hqd,hdk->hqk"}> : () -> ()
    %cst_6 = arith.constant dense<0.000000e+00> : vector<4x8x8xf32>
    %15 = tpu.matmul %14, %11, %cst_6 {dimension_numbers = #tpu.dot_dimension_numbers<[2], [1], [1], [2], [0, 0, 0, 1, 1, 2], [0], [0]>} : vector<4x8x8xf32>, vector<4x8x8xf32>, vector<4x8x8xf32> -> vector<4x8x8xf32>
    "tpu.trace_stop"() : () -> ()
    %c0_7 = arith.constant 0 : index
    %c0_8 = arith.constant 0 : index
    %c0_9 = arith.constant 0 : index
    %16 = vector.load %arg2[%c0_7, %c0_8, %c0_9] : memref<1x1x8xf32, #tpu.memory_space<vmem>>, vector<1x1x8xf32>
    %17 = vector.shape_cast %16 : vector<1x1x8xf32> to vector<1x8xf32>
    %cst_10 = arith.constant 5.000000e-01 : f32
    %18 = vector.broadcast %cst_10 : f32 to vector<1x8xf32>
    %19 = arith.cmpf ogt, %17, %18 : vector<1x8xf32>
    %cst_11 = arith.constant 0.000000e+00 : f32
    %cst_12 = arith.constant -1.000000e+30 : f32
    %20 = vector.broadcast %cst_11 : f32 to vector<1x8xf32>
    %21 = vector.broadcast %cst_12 : f32 to vector<1x8xf32>
    %22 = arith.select %19, %20, %21 : vector<1x8xi1>, vector<1x8xf32>
    %23 = vector.shape_cast %22 : vector<1x8xf32> to vector<1x1x8xf32>
    %24 = vector.broadcast %23 : vector<1x1x8xf32> to vector<4x8x8xf32>
    %25 = arith.addf %15, %24 : vector<4x8x8xf32>
    %cst_13 = arith.constant dense<0xFF800000> : vector<4x8xf32>
    %26 = vector.multi_reduction <maximumf>, %25, %cst_13 [2] : vector<4x8x8xf32> to vector<4x8xf32>
    %27 = vector.shape_cast %26 : vector<4x8xf32> to vector<4x8x1xf32>
    %28 = vector.broadcast %27 : vector<4x8x1xf32> to vector<4x8x8xf32>
    %29 = arith.subf %25, %28 : vector<4x8x8xf32>
    %30 = math.exp %29 : vector<4x8x8xf32>
    %cst_14 = arith.constant dense<0.000000e+00> : vector<4x8xf32>
    %31 = vector.multi_reduction <add>, %30, %cst_14 [2] : vector<4x8x8xf32> to vector<4x8xf32>
    %32 = vector.shape_cast %31 : vector<4x8xf32> to vector<4x8x1xf32>
    %33 = tpu.reciprocal %32 {approx = true} : vector<4x8x1xf32> -> vector<4x8x1xf32>
    %34 = vector.broadcast %33 : vector<4x8x1xf32> to vector<4x8x8xf32>
    %35 = arith.mulf %30, %34 : vector<4x8x8xf32>
    "tpu.trace_start"() <{level = 10 : i32, message = "hdk,hqk->hdq"}> : () -> ()
    %cst_15 = arith.constant dense<0.000000e+00> : vector<4x8x8xf32>
    %36 = tpu.matmul %13, %35, %cst_15 {dimension_numbers = #tpu.dot_dimension_numbers<[2], [2], [1], [1], [0, 0, 0, 1, 1, 1], [0], [0]>} : vector<4x8x8xf32>, vector<4x8x8xf32>, vector<4x8x8xf32> -> vector<4x8x8xf32>
    "tpu.trace_stop"() : () -> ()
    %37 = vector.shape_cast %36 : vector<4x8x8xf32> to vector<32x8xf32>
    %38 = tpu.transpose %37, [1, 0] : vector<32x8xf32> -> vector<8x32xf32>
    %c0_16 = arith.constant 0 : index
    %c0_17 = arith.constant 0 : index
    %39 = vector.load %arg5[%c0_16, %c0_17] : memref<32x32xf32, #tpu.memory_space<vmem>>, vector<32x32xf32>
    %cst_18 = arith.constant dense<0.000000e+00> : vector<8x32xf32>
    %40 = tpu.matmul %38, %39, %cst_18 {dimension_numbers = #tpu.dot_dimension_numbers<[1], [0], [0], [1], [0, 0, 1, 1], [], []>} : vector<8x32xf32>, vector<32x32xf32>, vector<8x32xf32> -> vector<8x32xf32>
    %c0_19 = arith.constant 0 : index
    %c0_20 = arith.constant 0 : index
    %41 = vector.load %arg6[%c0_19, %c0_20] : memref<1x32xf32, #tpu.memory_space<vmem>>, vector<1x32xf32>
    %42 = vector.broadcast %41 : vector<1x32xf32> to vector<8x32xf32>
    %43 = arith.addf %40, %42 : vector<8x32xf32>
    %44 = arith.addf %1, %43 : vector<8x32xf32>
    %cst_21 = arith.constant dense<0.000000e+00> : vector<8xf32>
    %45 = vector.multi_reduction <add>, %44, %cst_21 [1] : vector<8x32xf32> to vector<8xf32>
    %46 = vector.shape_cast %45 : vector<8xf32> to vector<8x1xf32>
    %cst_22 = arith.constant 3.200000e+01 : f32
    %47 = vector.broadcast %cst_22 : f32 to vector<8x1xf32>
    %48 = arith.divf %46, %47 : vector<8x1xf32>
    %49 = vector.broadcast %48 : vector<8x1xf32> to vector<8x32xf32>
    %50 = arith.subf %44, %49 : vector<8x32xf32>
    %51 = vector.broadcast %48 : vector<8x1xf32> to vector<8x32xf32>
    %52 = arith.subf %44, %51 : vector<8x32xf32>
    %53 = arith.mulf %50, %52 : vector<8x32xf32>
    %cst_23 = arith.constant dense<0.000000e+00> : vector<8xf32>
    %54 = vector.multi_reduction <add>, %53, %cst_23 [1] : vector<8x32xf32> to vector<8xf32>
    %55 = vector.shape_cast %54 : vector<8xf32> to vector<8x1xf32>
    %cst_24 = arith.constant 3.200000e+01 : f32
    %56 = vector.broadcast %cst_24 : f32 to vector<8x1xf32>
    %57 = arith.divf %55, %56 : vector<8x1xf32>
    %58 = vector.broadcast %48 : vector<8x1xf32> to vector<8x32xf32>
    %59 = arith.subf %44, %58 : vector<8x32xf32>
    %cst_25 = arith.constant 9.99999974E-6 : f32
    %60 = vector.broadcast %cst_25 : f32 to vector<8x1xf32>
    %61 = arith.addf %57, %60 : vector<8x1xf32>
    %62 = math.rsqrt %61 : vector<8x1xf32>
    %63 = vector.broadcast %62 : vector<8x1xf32> to vector<8x32xf32>
    %64 = arith.mulf %59, %63 : vector<8x32xf32>
    %c0_26 = arith.constant 0 : index
    %c0_27 = arith.constant 0 : index
    %65 = vector.load %arg7[%c0_26, %c0_27] : memref<1x32xf32, #tpu.memory_space<vmem>>, vector<1x32xf32>
    %66 = vector.broadcast %65 : vector<1x32xf32> to vector<8x32xf32>
    %67 = arith.mulf %64, %66 : vector<8x32xf32>
    %c0_28 = arith.constant 0 : index
    %c0_29 = arith.constant 0 : index
    %68 = vector.load %arg8[%c0_28, %c0_29] : memref<1x32xf32, #tpu.memory_space<vmem>>, vector<1x32xf32>
    %69 = vector.broadcast %68 : vector<1x32xf32> to vector<8x32xf32>
    %70 = arith.addf %67, %69 : vector<8x32xf32>
    %c0_30 = arith.constant 0 : index
    %c0_31 = arith.constant 0 : index
    %c0_32 = arith.constant 0 : index
    %71 = vector.load %arg9[%c0_30, %c0_31, %c0_32] : memref<1x8x32xf32, #tpu.memory_space<vmem>>, vector<1x8x32xf32>
    %72 = vector.shape_cast %71 : vector<1x8x32xf32> to vector<8x32xf32>
    %73 = vector.shape_cast %70 : vector<8x32xf32> to vector<1x8x32xf32>
    tpu.vector_store %arg9[%c0_30, %c0_31, %c0_32], %73 {strides = array<i32>} : memref<1x8x32xf32, #tpu.memory_space<vmem>>, vector<1x8x32xf32>,
    return
  }
  func.func @transform_0(%arg0: i32) -> (i32, i32, i32) {
    %c0_i32 = arith.constant 0 : i32
    %c0_i32_0 = arith.constant 0 : i32
    %c0_i32_1 = arith.constant 0 : i32
    return %arg0, %c0_i32, %c0_i32_0 : i32, i32, i32
  }
  func.func @transform_1(%arg0: i32) -> (i32, i32, i32) {
    %c0_i32 = arith.constant 0 : i32
    %c0_i32_0 = arith.constant 0 : i32
    %c0_i32_1 = arith.constant 0 : i32
    return %arg0, %c0_i32, %c0_i32_0 : i32, i32, i32
  }
  func.func @transform_2(%arg0: i32) -> (i32, i32) {
    %c0_i32 = arith.constant 0 : i32
    %c0_i32_0 = arith.constant 0 : i32
    %c0_i32_1 = arith.constant 0 : i32
    return %c0_i32, %c0_i32_0 : i32, i32
  }
  func.func @transform_3(%arg0: i32) -> (i32, i32) {
    %c0_i32 = arith.constant 0 : i32
    %c0_i32_0 = arith.constant 0 : i32
    %c0_i32_1 = arith.constant 0 : i32
    return %c0_i32, %c0_i32_0 : i32, i32
  }
  func.func @transform_4(%arg0: i32) -> (i32, i32) {
    %c0_i32 = arith.constant 0 : i32
    %c0_i32_0 = arith.constant 0 : i32
    %c0_i32_1 = arith.constant 0 : i32
    return %c0_i32, %c0_i32_0 : i32, i32
  }
  func.func @transform_5(%arg0: i32) -> (i32, i32) {
    %c0_i32 = arith.constant 0 : i32
    %c0_i32_0 = arith.constant 0 : i32
    %c0_i32_1 = arith.constant 0 : i32
    return %c0_i32, %c0_i32_0 : i32, i32
  }
  func.func @transform_6(%arg0: i32) -> (i32, i32) {
    %c0_i32 = arith.constant 0 : i32
    %c0_i32_0 = arith.constant 0 : i32
    %c0_i32_1 = arith.constant 0 : i32
    return %c0_i32, %c0_i32_0 : i32, i32
  }
  func.func @transform_7(%arg0: i32) -> (i32, i32) {
    %c0_i32 = arith.constant 0 : i32
    %c0_i32_0 = arith.constant 0 : i32
    %c0_i32_1 = arith.constant 0 : i32
    return %c0_i32, %c0_i32_0 : i32, i32
  }
  func.func @transform_8(%arg0: i32) -> (i32, i32, i32) {
    %c0_i32 = arith.constant 0 : i32
    %c0_i32_0 = arith.constant 0 : i32
    %c0_i32_1 = arith.constant 0 : i32
    return %arg0, %c0_i32, %c0_i32_0 : i32, i32, i32
  }
}

</mosaic_0001>

<bundles_post_ra>
// kernel: tpu_custom_call.1
= control target key start
LH: loop header
LB: loop body
LE: loop exit
PB: predicated region body
PF: predicated region fallthrough
CT: control target
= control target key end

     0   :  { %13 = vsyncpa [#allocation3], 0  ;;  %s2183_s0 = inlined_call_operand.vmem [shape: f32[2,8,32], index: 0, kind: input, shape index: {}]   ;;  %s2184_s1 = inlined_call_operand.vmem [shape: f32[2,1,8], index: 1, kind: input, shape index: {}]   ;;  %s2185_s2 = inlined_call_operand.vmem [shape: f32[96,32], index: 2, kind: input, shape index: {}]   ;;  %s2186_s3 = inlined_call_operand.vmem [shape: f32[96,1], index: 3, kind: input, shape index: {}]   ;;  %s2187_s4 = inlined_call_operand.vmem [shape: f32[32,32], index: 4, kind: input, shape index: {}]   ;;  %s2188_s5 = inlined_call_operand.vmem [shape: f32[1,32], index: 5, kind: input, shape index: {}]   ;;  %s2189_s6 = inlined_call_operand.vmem [shape: f32[1,32], index: 6, kind: input, shape index: {}]   ;;  %s2190_s7 = inlined_call_operand.vmem [shape: f32[1,32], index: 7, kind: input, shape index: {}]   ;;  %s2191_s8 = inlined_call_operand.hbm [shape: f32[2,8,32], index: 8, kind: output, shape index: {}]  }
   0x1   :  { %15 = vsyncpa [#allocation3 + $0x1], 0  ;;  %s1902_s27 = smov 0   ;;  %s1904_s28 = smov 0  }
   0x2   :  { %s1906_s29 = smov 0   ;;  %s1908_s30 = smov 0  }
   0x3 LB: > { %s1923_s9 = sadd.s32 4294967295, %s1849_s30   ;;  %s1573_s10 = sadd.s32 4294967294, %s1849_s30   ;;  %s1849_s30 = sphi %s1908_s30, %s2197_s30   ;;  %s1845_s29 = sphi %s1906_s29, %s2196_s29   ;;  %s1841_s28 = sphi %s1904_s28, %s2195_s28   ;;  %s1837_s27 = sphi %s1902_s27, %s2194_s27  }
   0x4   : > { %s1927_s11 = sadd.s32 1, %s1849_s30   ;;  %s206_s12 = sadd.s32 1, %s1845_s29 }
   0x5   : > { %s203_s13 = ssub.s32 %s1849_s30, %s1927_s11  ;;  %p216_p0 = scmp.ne.s32.totalorder %s1845_s29, %s1841_s28 }
   0x6   : > { %p204_p1 = scmp.eq.s32.totalorder %s203_s13, 0  ;;  %p217_p2 = scmp.eq.s32.totalorder %s1923_s9, 1 }
   0x7   : > { %p222_p3 = scmp.ne.s32.totalorder %s1841_s28, %s1837_s27  ;;  %p223_p4 = scmp.eq.s32.totalorder %s1573_s10, 1 }
   0x8   : > { %s1938_s14 = scalar_select %p204_p1, %s1845_s29, %s206_s12  }
   0x9   : > { %p1940_p5 = por %p217_p2, %p216_p0  ;;  %p1944_p6 = por %p223_p4, %p222_p3 }
   0xa   : > { %p1576_p7 = scmp.ge.s32.totalorder %s1849_s30, 1  ;;  %p272_p8 = scmp.lt.s32.totalorder %s1849_s30, 3 }
   0xc   : > { %p273_p9 = pnand %p1576_p7, %p272_p8 }
   0xd   : > { %p308_p10 = scmp.lt.s32.totalorder (!%p273_p9), %s1923_s9, 1  ;;  %vm400_vm0 = vcmask (!%p273_p9), 261120   ;;  %v316_v0 = vld [vmem:[%s2185_s2] sm:$0xff] (!%p273_p9)  ;;  %v1851_v1 = vmov (!%p273_p9), 0   ;;  %v330_v3 = vld [vmem:[%s2186_s3 + $0x10] sm:$0xff] (!%p273_p9)  ;;  %v329_v4 = vld [vmem:[%s2186_s3 + $0x8] sm:$0xff] (!%p273_p9)  ;;  %v697_v55 = vlaneseq (!%p273_p9) }
   0xe   : > { %276 = sbr.rel (%p273_p9) target bundleno = 1789 (0x6fd), region = 52  ;;  %1648 = vmatprep.mubr.msk.f32.mxu0 (!%p273_p9), %vm400_vm0, %v316_v0  ;;  %1767 = vset.pattern.permute.xlu0 (!%p273_p9), %v1851_v1  ;;  %v328_v2 = vld [vmem:[%s2186_s3] sm:$0xff] (!%p273_p9)  ;;  %v331_v6 = vld [vmem:[%s2186_s3 + $0x18] sm:$0xff] (!%p273_p9)  ;;  %v317_v7 = vld [vmem:[%s2185_s2 + $0x8] sm:$0xff] (!%p273_p9)  ;;  %v1852_v18 = vmov (!%p273_p9), 0.0   ;;  %vm1853_vm1 = vmmov (!%p273_p9), 0  }
   0xf   : > { %1768 = vset.pattern.permute.xlu1 (!%p273_p9), %v1851_v1  ;;  %342 = vperm.xlu0 (!%p273_p9), %1767, %v328_v2   ;;  %v318_v8 = vld [vmem:[%s2185_s2 + $0x10] sm:$0xff] (!%p273_p9)  ;;  %v332_v9 = vld [vmem:[%s2186_s3 + $0x20] sm:$0xff] (!%p273_p9)  ;;  %v333_v10 = vld [vmem:[%s2186_s3 + $0x28] sm:$0xff] (!%p273_p9)  ;;  %vm702_vm2 = vcmask (!%p273_p9), 64512   ;;  %v698_v57 = vshrl.u32 (!%p273_p9), %v697_v55, 7  ;;  %s305_s21 = sand.u32 (!%p273_p9), 1, %s1841_s28  }
  0x10   : > { %352 = vperm.xlu1 (!%p273_p9), %1768, %v330_v3   ;;  %v319_v11 = vld [vmem:[%s2185_s2 + $0x18] sm:$0xff] (!%p273_p9)  ;;  %v320_v12 = vld [vmem:[%s2185_s2 + $0x20] sm:$0xff] (!%p273_p9)  ;;  %v334_v13 = vld [vmem:[%s2186_s3 + $0x30] sm:$0xff] (!%p273_p9)  ;;  %1671 = vmatprep.subr.mxu1 (!%p273_p9), %v1852_v18  ;;  %v1854_v59 = vmov (!%p273_p9), -1e+30   ;;  %s1577_s22 = sshll.u32 (!%p273_p9), %s305_s21, 3 }
  0x11   : > { %v335_v14 = vld [vmem:[%s2186_s3 + $0x38] sm:$0xff] (!%p273_p9)  ;;  %v321_v15 = vld [vmem:[%s2185_s2 + $0x28] sm:$0xff] (!%p273_p9)  ;;  %v322_v16 = vld [vmem:[%s2185_s2 + $0x30] sm:$0xff] (!%p273_p9)  ;;  %1673 = vmatprep.mubr.msk.f32.mxu1 (!%p273_p9), %vm1853_vm1, %v1852_v18  ;;  %v699_v58 = vsub.s32 (!%p273_p9), 0, %v698_v57  ;;  %s1492_s20 = scalar_lea.sflag (!%p273_p9), [#allocation3], %s305_s21 }
  0x12   : > { %v323_v17 = vld [vmem:[%s2185_s2 + $0x38] sm:$0xff] (!%p273_p9)  ;;  %v324_v19 = vld [vmem:[%s2185_s2 + $0x40] sm:$0xff] (!%p273_p9)  ;;  %v325_v20 = vld [vmem:[%s2185_s2 + $0x48] sm:$0xff] (!%p273_p9) }
  0x13   : > { %347 = vperm.xlu0 (!%p273_p9), %1767, %v329_v4   ;;  %v326_v21 = vld [vmem:[%s2185_s2 + $0x50] sm:$0xff] (!%p273_p9)  ;;  %v327_v22 = vld [vmem:[%s2185_s2 + $0x58] sm:$0xff] (!%p273_p9) }
  0x14   : > { %357 = vperm.xlu1 (!%p273_p9), %1768, %v331_v6  }
  0x15   : > { %s1956_s19 = scalar_select %p308_p10, %s1923_s9, 1 }
  0x17   : > { %s1578_s24 = sshll.u32 %s1956_s19, 3  ;;  %362 = vperm.xlu0 %1767, %v332_v9   ;;  %s314_s12 = scalar_lea.vmem %s2184_s1, %s1956_s19 }
  0x18   : > { %s311_s10 = scalar_lea.vmem %s2183_s0, %s1578_s24  ;;  %367 = vperm.xlu1 %1768, %v333_v10   ;;  %v693_v56 = vld [vmem:[%s314_s12] sm:$0x1]  ;;  %s307_s12 = scalar_lea.vmem [#allocation2], %s1577_s22 }
  0x19   : > { %v1971_v5 = vld [vmem:[%s311_s10] sm:$0xff]  ;;  %vm694_vm3 = vcmp.gt.f32.partialorder %v693_v56, 0.5  ;;  %s1609_s10 = sshll.u32 %s1923_s9, 7  ;;  %s1505_s19 = sshll.u32 %s307_s12, 4  ;;  %s2142_s19 = int_to_ptr.vmem [resolvable:$true] %s1505_s19 }
  0x1a   : > { %1646 = vmatprep.subr.msk.mxu0 %vm400_vm0, %v1971_v5  ;;  %v695_v60 = vsel %vm694_vm3, 0.0, %v1854_v59  ;;  %s2140_s18 = scalar_lea.hbm %s2191_s8, %s1609_s10  ;;  %s1787_s23 = scalar_lea.vmem %s2142_s19, 128 }
  0x1b   : > { %1647 = vmatpush3.xpose.msk.msra.mxu0 %vm400_vm0, %v1971_v5  ;;  %372 = vperm.xlu0 %1767, %v334_v13   ;;  %v700_v61 = vrot.slane %v695_v60, %v699_v58  ;;  %p1788_p11 = scmp.ne.s32.totalorder %s2142_s19, %s1787_s23  ;;  %s1856_s9 = smov [#allocation2]  }
  0x1c   : > { %377 = vperm.xlu1 %1768, %v335_v14   ;;  %1666 = vmatprep.subr.mxu0 %v1852_v18  ;;  %s1791_s22 = sshll.u32 %s1856_s9, 4  ;;  %s1792_s22 = int_to_ptr.vmem [resolvable:$false] %s1791_s22 }
  0x1d   : > { %p1789_p12 = pnand %p1788_p11, %p1940_p5  ;;  %s1793_s24 = scalar_lea.vmem %s1792_s22, 256 }
  0x1e   : > { %1649 = vmatmul.mubr.msk.f32.vlgmr.msra.gmra.mrb[0].mxu0 %vm400_vm0, %v317_v7  ;;  %p1794_p0 = scmp.lt.s32.totalorder %s2142_s19, %s1792_s22  ;;  %p1795_p1 = scmp.lt.s32.totalorder %s1793_s24, %s1787_s23 }
  0x1f   : > { %1651 = vmatprep.mubr.msk.f32.mxu0 %vm400_vm0, %v318_v8  ;;  %p1790_p13 = pneg %p1789_p12 }
  0x20   : > { %p1796_p2 = por %p1795_p1, %p1794_p0 }
  0x22   : > { %1652 = vmatmul.mubr.msk.f32.gmra.mrb[2].mxu0 %vm400_vm0, %v319_v11  ;;  %p1797_p3 = pnand %p1796_p2, %p1790_p13 }
  0x23   : > { %1654 = vmatprep.mubr.msk.f32.mxu0 %vm400_vm0, %v320_v12 }
  0x26   : > { %1655 = vmatmul.mubr.msk.f32.gmra.mrb[4].mxu0 %vm400_vm0, %v321_v15  ;;  %v336_v15 = vld [vmem:[%s2186_s3 + $0x40] sm:$0xff] }
  0x27   : > { %1657 = vmatprep.mubr.msk.f32.mxu0 %vm400_vm0, %v322_v16 }
  0x2a   : > { %1658 = vmatmul.mubr.msk.f32.gmra.mrb[6].mxu0 %vm400_vm0, %v323_v17 }
  0x2b   : > { %1660 = vmatprep.mubr.msk.f32.mxu0 %vm400_vm0, %v324_v19 }
  0x2e   : > { %1661 = vmatmul.mubr.msk.f32.gmra.mrb[8].mxu0 %vm400_vm0, %v325_v20 }
  0x2f   : > { %1663 = vmatprep.mubr.msk.f32.mxu0 %vm400_vm0, %v326_v21 }
  0x32   : > { %1664 = vmatmul.mubr.msk.f32.gmra.mrb[10].mxu0 %vm400_vm0, %v327_v22 }
  0x33   : > { %1668 = vmatprep.mubr.msk.f32.mxu0 %vm1853_vm1, %v1852_v18 }
  0x8e   : > { %v343_v23 = vpop.permute.xlu0 %342 }
  0x8f   : > { %v353_v24 = vpop.permute.xlu1 %352 }
  0x92   : > { %v348_v25 = vpop.permute.xlu0 %347 }
  0x93   : > { %v358_v29 = vpop.permute.xlu1 %357 }
  0x96   : > { %v363_v36 = vpop.permute.xlu0 %362 }
  0x97   : > { %v368_v34 = vpop.permute.xlu1 %367 }
  0x9a   : > { %v373_v48 = vpop.permute.xlu0 %372 }
  0x9b   : > { %v378_v47 = vpop.permute.xlu1 %377 }
  0xf1   : > { %v1650_v26 = vpop.f32.mrb[0].mxu0 }
  0xf2   : > { %v512_v27 = vadd.f32 %v1650_v26, %v348_v25  ;;  %v506_v28 = vpop.f32.mrb[1].mxu0 }
  0xf3   : > { %v507_v30 = vadd.f32 %v506_v28, %v343_v23 }
  0xf4   : > { %597 = vxpose.xlu1.b32.start.end [1/1] (short) (narrow) %v512_v27, 8 }
  0xf5   : > { %v1653_v31 = vpop.f32.mrb[2].mxu0  ;;  %565 = vxpose.xlu0.b32.start.end [1/1] (short) (narrow) %v507_v30, 8 }
  0xf6   : > { %v516_v32 = vpop.f32.mrb[3].mxu0  ;;  %v522_v39 = vadd.f32 %v1653_v31, %v358_v29 }
  0xf7   : > { %v517_v33 = vadd.f32 %v516_v32, %v353_v24 }
  0xf9   : > { %v1656_v35 = vpop.f32.mrb[4].mxu0  ;;  %629 = vxpose.xlu0.b32.start.end [1/1] (short) (narrow) %v517_v33, 8 }
  0xfa   : > { %v532_v37 = vadd.f32 %v1656_v35, %v368_v34  ;;  %v526_v38 = vpop.f32.mrb[5].mxu0 }
  0xfb   : > { %v527_v40 = vadd.f32 %v526_v38, %v363_v36  ;;  %v339_v38 = vld [vmem:[%s2186_s3 + $0x58] sm:$0xff] }
  0xfc   : > { %1672 = vmatpush3.msra.mxu1 %v532_v37  ;;  %v338_v37 = vld [vmem:[%s2186_s3 + $0x50] sm:$0xff] }
  0xfd   : > { %v1659_v41 = vpop.f32.mrb[6].mxu0  ;;  %1667 = vmatpush3.msra.mxu0 %v527_v40  ;;  %661 = vxpose.xlu0.b32.start.end [1/1] (short) (narrow) %v522_v39, 8  ;;  %v337_v39 = vld [vmem:[%s2186_s3 + $0x48] sm:$0xff] }
  0xfe   : > { %v536_v42 = vpop.f32.mrb[7].mxu0  ;;  %1676 = vmatprep.subr.mxu1 %v1852_v18  ;;  %1701 = vmatprep.subr.mxu0 %v1852_v18  ;;  %v542_v52 = vadd.f32 %v1659_v41, %v378_v47 }
  0xff   : > { %v537_v49 = vadd.f32 %v536_v42, %v373_v48 }
 0x101   : > { %v2044_v43 = vpop.f32.mrb[8].mxu0 }
 0x102   : > { %v2046_v44 = vpop.f32.mrb[9].mxu0 }
 0x105   : > { %v2048_v45 = vpop.f32.mrb[10].mxu0 }
 0x106   : > { %v2050_v46 = vpop.f32.mrb[11].mxu0 }
 0x174   : > { %v613_v50 = vpop.trf.xlu1 }
 0x175   : > { %1674 = vmatmul.mubr.msk.f32.vlgmr.msra.gmra.mrb[0].mxu1 %vm702_vm2, %v613_v50  ;;  %v581_v51 = vpop.trf.xlu0 }
 0x176   : > { %1677 = vmatpush3.msra.mxu1 %v537_v49  ;;  %1669 = vmatmul.mubr.msk.f32.vlgmr.msra.gmra.mrb[12].mxu0 %vm702_vm2, %v581_v51 }
 0x177   : > { %1678 = vmatprep.mubr.msk.f32.mxu1 %vm1853_vm1, %v1852_v18  ;;  %1681 = vmatprep.subr.mxu1 %v1852_v18 }
 0x178   : > { %1703 = vmatprep.mubr.msk.f32.mxu0 %vm1853_vm1, %v1852_v18 }
 0x179   : > { %v645_v53 = vpop.trf.xlu0 }
 0x17a   : > { %1679 = vmatmul.mubr.msk.f32.vlgmr.msra.gmra.mrb[2].mxu1 %vm702_vm2, %v645_v53 }
 0x17b   : > { %1682 = vmatpush3.msra.mxu1 %v542_v52  ;;  %1683 = vmatprep.mubr.msk.f32.mxu1 %vm1853_vm1, %v1852_v18 }
 0x17c   : > { %1686 = vmatprep.subr.mxu1 %v1852_v18 }
 0x17d   : > { %v677_v54 = vpop.trf.xlu0 }
 0x17e   : > { %1684 = vmatmul.mubr.msk.f32.vlgmr.msra.gmra.mrb[4].mxu1 %vm702_vm2, %v677_v54 }
 0x17f   : > { %1688 = vmatprep.mubr.msk.f32.mxu1 %vm1853_vm1, %v1852_v18 }
 0x248   : > { %v845_v62 = vpop.f32.mrb[0].mxu1 }
 0x249   : > { %v846_v63 = vadd.f32 %v845_v62, %v700_v61  ;;  %v772_v0 = vpop.f32.mrb[12].mxu0  ;;  %v1675_v1 = vpop.f32.mrb[1].mxu1 }
 0x24a   : > { %v773_v2 = vadd.f32 %v772_v0, %v700_v61  ;;  %v1670_v3 = vpop.f32.mrb[13].mxu0  ;;  %v1378_v1 = vld [vmem:[%s2187_s4 + $0x18] sm:$0xff] }
 0x24b   : > { %v998_v4 = vsel %vm702_vm2, %v846_v63, -inf }
 0x24c   : > { %999 = vmax.xlane.f32.xlu1 %v998_v4  ;;  %v995_v6 = vsel %vm702_vm2, %v773_v2, -inf }
 0x24d   : > { %996 = vmax.xlane.f32.xlu0 %v995_v6  ;;  %v918_v7 = vpop.f32.mrb[2].mxu1 }
 0x24e   : > { %v919_v8 = vadd.f32 %v918_v7, %v700_v61  ;;  %v1680_v9 = vpop.f32.mrb[3].mxu1 }
 0x250   : > { %v1001_v10 = vsel %vm702_vm2, %v919_v8, -inf }
 0x251   : > { %1002 = vmax.xlane.f32.xlu1 %v1001_v10  ;;  %v991_v11 = vpop.f32.mrb[4].mxu1 }
 0x252   : > { %v992_v12 = vadd.f32 %v991_v11, %v700_v61  ;;  %v1685_v13 = vpop.f32.mrb[5].mxu1 }
 0x254   : > { %v1004_v14 = vsel %vm702_vm2, %v992_v12, -inf }
 0x255   : > { %1005 = vmax.xlane.f32.xlu0 %v1004_v14 }
 0x262   : > { %382 = vperm.xlu1 %1768, %v336_v15  }
 0x2d9   : > { %v1000_v16 = vpop.xlane.xlu1 %999 }
 0x2da   : > { %v1008_v17 = vsub.f32 %v846_v63, %v1000_v16  ;;  %v997_v19 = vpop.xlane.xlu0 %996  ;;  %v1855_v63 = vmov 0.0|0.0  }
 0x2db   : > { %v1007_v20 = vsub.f32 %v773_v2, %v997_v19 }
 0x2dc   : > { %v1013_v21 = vmul.f32 1.442695, %v1008_v17 }
 0x2dd   : > { %v1011_v22 = vmul.f32 1.442695, %v1007_v20 }
 0x2de   : > { %1769 = vpow2.f32 %v1013_v21  ;;  %v1003_v23 = vpop.xlane.xlu1 %1002 }
 0x2df   : > { %1771 = vpow2.f32 %v1011_v22  ;;  %v1009_v24 = vsub.f32 %v919_v8, %v1003_v23 }
 0x2e1   : > { %v1015_v25 = vmul.f32 1.442695, %v1009_v24 }
 0x2e2   : > { %v1006_v26 = vpop.xlane.xlu0 %1005  ;;  %v383_v40 = vpop.permute.xlu1 %382 }
 0x2e3   : > { %1773 = vpow2.f32 %v1015_v25  ;;  %v1010_v27 = vsub.f32 %v992_v12, %v1006_v26  ;;  %v547_v53 = vadd.f32 %v2046_v44, %v383_v40  ;;  %v1604_v12 = vld [vmem:[%s2188_s5] ss:$0 sm:$0xff] }
 0x2e5   : > { %v1017_v28 = vmul.f32 1.442695, %v1010_v27 }
 0x2e7   : > { %1775 = vpow2.f32 %v1017_v28 }
 0x2e8   : > { %v1770_v29 = vpop.eup %1769 }
 0x2e9   : > { %v1772_v30 = vpop.eup %1771  ;;  %v1022_v31 = vsel %vm702_vm2, %v1770_v29, 0.0 }
 0x2ea   : > { %1023 = vadd.xlane.f32.xlu0 %v1022_v31  ;;  %v1019_v32 = vsel %vm702_vm2, %v1772_v30, 0.0 }
 0x2eb   : > { %1020 = vadd.xlane.f32.xlu1 %v1019_v32 }
 0x2ed   : > { %v1774_v33 = vpop.eup %1773 }
 0x2ee   : > { %v1025_v34 = vsel %vm702_vm2, %v1774_v33, 0.0 }
 0x2ef   : > { %1026 = vadd.xlane.f32.xlu1 %v1025_v34 }
 0x2f1   : > { %v1776_v35 = vpop.eup %1775 }
 0x2f2   : > { %v1028_v36 = vsel %vm702_vm2, %v1776_v35, 0.0 }
 0x2f3   : > { %1029 = vadd.xlane.f32.xlu0 %v1028_v36 }
 0x300   : > { %392 = vperm.xlu1 %1768, %v338_v37  }
 0x304   : > { %397 = vperm.xlu1 %1768, %v339_v38  }
 0x309   : > { %387 = vperm.xlu0 %1767, %v337_v39  }
 0x377   : > { %v1024_v41 = vpop.xlane.xlu0 %1023 }
 0x378   : > { %v1021_v42 = vpop.xlane.xlu1 %1020 }
 0x379   : > { %1777 = vrcp.f32 %v1021_v42 }
 0x37a   : > { %1779 = vrcp.f32 %v1024_v41 }
 0x37c   : > { %v1027_v47 = vpop.xlane.xlu1 %1026 }
 0x37d   : > { %1781 = vrcp.f32 %v1027_v47 }
 0x380   : > { %v1030_v48 = vpop.xlane.xlu0 %1029  ;;  %v393_v52 = vpop.permute.xlu1 %392 }
 0x381   : > { %1783 = vrcp.f32 %v1030_v48  ;;  %v557_v61 = vadd.f32 %v2050_v46, %v393_v52  ;;  %v1376_v46 = vld [vmem:[%s2187_s4 + $0x8] sm:$0xff] }
 0x383   : > { %v1778_v49 = vpop.eup %1777 }
 0x384   : > { %v1035_v50 = vmul.f32 %v1778_v49, %v1772_v30  ;;  %v1780_v51 = vpop.eup %1779  ;;  %v398_v44 = vpop.permute.xlu1 %397 }
 0x385   : > { %v1036_v54 = vmul.f32 %v1780_v51, %v1770_v29  ;;  %v562_v62 = vadd.f32 %v2048_v45, %v398_v44  ;;  %v1377_v45 = vld [vmem:[%s2187_s4 + $0x10] sm:$0xff]  ;;  %v1607_v29 = vld [vmem:[%s2190_s7] ss:$0 sm:$0xff] }
 0x386   : > { %1687 = vmatpush3.xpose.msk.msra.mxu1 %vm702_vm2, %v1035_v50 }
 0x387   : > { %1691 = vmatprep.subr.mxu1 %v1852_v18  ;;  %v1782_v56 = vpop.eup %1781 }
 0x388   : > { %v388_v55 = vpop.permute.xlu0 %387  ;;  %v1037_v59 = vmul.f32 %v1782_v56, %v1774_v33 }
 0x389   : > { %1689 = vmatmul.mubr.msk.f32.vlgmr.msra.gmra.mrb[6].mxu1 %vm702_vm2, %v547_v53  ;;  %v552_v58 = vadd.f32 %v2044_v43, %v388_v55  ;;  %v1375_v43 = vld [vmem:[%s2187_s4] sm:$0xff] }
 0x38a   : > { %1692 = vmatpush3.xpose.msk.msra.mxu1 %vm702_vm2, %v1036_v54  ;;  %1693 = vmatprep.mubr.msk.f32.mxu1 %vm1853_vm1, %v1852_v18  ;;  %v1718_v0 = vpack.c.bf16 %v1376_v46, %v1375_v43 }
 0x38b   : > { %v1784_v57 = vpop.eup %1783  ;;  %1696 = vmatprep.subr.mxu1 %v1852_v18 }
 0x38c   : > { %v1038_v60 = vmul.f32 %v1784_v57, %v1776_v35 }
 0x38d   : > { %1694 = vmatmul.mubr.msk.f32.vlgmr.msra.gmra.mrb[8].mxu1 %vm702_vm2, %v552_v58 }
 0x38e   : > { %1697 = vmatpush3.xpose.msk.msra.mxu1 %vm702_vm2, %v1037_v59  ;;  %1702 = vmatpush3.xpose.msk.msra.mxu0 %vm702_vm2, %v1038_v60 }
 0x38f   : > { %1698 = vmatprep.mubr.msk.f32.mxu1 %vm1853_vm1, %v1852_v18  ;;  %1717 = vmatprep.subr.bf16.mxu1 %v1855_v63 }
 0x391   : > { %1699 = vmatmul.mubr.msk.f32.vlgmr.msra.gmra.mrb[10].mxu1 %vm702_vm2, %v557_v61  ;;  %1704 = vmatmul.mubr.msk.f32.vlgmr.msra.gmra.mrb[14].mxu0 %vm702_vm2, %v562_v62 }
 0x392   : > { %1714 = vmatprep.mubr.msk.f32.mxu1 %vm1853_vm1, %v1852_v18  ;;  %1719 = vmatpush3.bf16.msra.mxu1 %v1718_v0  ;;  %v1721_v18 = vpack.c.bf16 %v1378_v1, %v1377_v45 }
 0x393   : > { %1720 = vmatprep.subr.bf16.mxu1 %v1855_v63 }
 0x396   : > { %1722 = vmatpush3.bf16.msra.mxu1 %v1721_v18 }
 0x45c   : > { %v1111_v2 = vpop.f32.mrb[6].mxu1 }
 0x45d   : > { %v1690_v3 = vpop.f32.mrb[7].mxu1  ;;  %1343 = vxpose.xlu0.b32.start [1/4] (short) (narrow) %v1111_v2, 8 }
 0x460   : > { %v1187_v4 = vpop.f32.mrb[8].mxu1 }
 0x461   : > { %1344 = vxpose.xlu0.b32.cont [2/4] (short) (narrow) %v1187_v4, 8  ;;  %v1695_v6 = vpop.f32.mrb[9].mxu1 }
 0x464   : > { %v1263_v7 = vpop.f32.mrb[10].mxu1  ;;  %v1339_v8 = vpop.f32.mrb[14].mxu0 }
 0x465   : > { %v1705_v9 = vpop.f32.mrb[15].mxu0  ;;  %1345 = vxpose.xlu0.b32.cont [3/4] (short) (narrow) %v1263_v7, 8  ;;  %v1700_v10 = vpop.f32.mrb[11].mxu1 }
 0x469   : > { %1346 = vxpose.xlu0.b32.end [4/4] (short) (narrow) %v1339_v8, 8 }
 0x4dd   : > { %v1359_v11 = vpop.trf.xlu0 }
 0x4de   : > { %1715 = vmatmul.mubr.msk.f32.vlgmr.msra.gmra.mrb[12].mxu1 %vm400_vm0, %v1359_v11 }
 0x5b1   : > { %v1455_v13 = vpop.f32.mrb[12].mxu1 }
 0x5b2   : > { %v1456_v14 = vadd.f32 %v1604_v12, %v1455_v13  ;;  %v1716_v15 = vpop.f32.mrb[13].mxu1 }
 0x5b4   : > { %v1459_v16 = vadd.f32 %v1456_v14, %v1971_v5  ;;  %v1606_v5 = vld [vmem:[%s2189_s6] ss:$0 sm:$0xff] }
 0x5b6   : > { %v1460_v17 = vsel %vm400_vm0, %v1459_v16, 0.0 }
 0x5b7   : > { %1461 = vadd.xlane.f32.xlu1 %v1460_v17 }
 0x644   : > { %v1462_v19 = vpop.xlane.xlu1 %1461 }
 0x645   : > { %v1464_v20 = vmul.f32 0.03125, %v1462_v19 }
 0x647   : > { %v1465_v21 = vsub.f32 %v1459_v16, %v1464_v20 }
 0x649   : > { %v1466_v22 = vmul.f32 %v1465_v21, %v1465_v21 }
 0x64b   : > { %v1467_v23 = vsel %vm400_vm0, %v1466_v22, 0.0 }
 0x64c   : > { %1468 = vadd.xlane.f32.xlu1 %v1467_v23 }
 0x6d9   : > { %v1469_v24 = vpop.xlane.xlu1 %1468 }
 0x6da   : > { %v1470_v25 = vmul.f32 0.03125, %v1469_v24 }
 0x6dc   : > { %v1471_v26 = vadd.f32 1e-05, %v1470_v25 }
 0x6de   : > { %1785 = vrsqrt.f32 %v1471_v26 }
 0x6e8   : > { %v1786_v27 = vpop.eup %1785 }
 0x6e9   : > { %v1473_v28 = vmul.f32 %v1786_v27, %v1465_v21 }
 0x6eb   : > { %v1481_v30 = vmul.f32 %v1606_v5, %v1473_v28 }
 0x6ed   : > { %v1489_v31 = vadd.f32 %v1607_v29, %v1481_v30 }
 0x6ef   : > { %1490 = vst.msk [vmem:[%s307_s12] sm:$0xff] %vm400_vm0, %v1489_v31 }
 0x6f0   : > { %1800 = shalt.err (!%p1797_p3)
}
 0x6f1   : > { %s1801_s21 = scalar_lea.hbm %s2140_s18, 128  ;;  %s1805_s10 = scalar_lea.hbm %s2191_s8, 256 }
 0x6f2   : > { %p1802_p4 = scmp.ne.s32.totalorder %s2140_s18, %s1801_s21  ;;  %p1806_p9 = scmp.lt.u32.totalorder %s2140_s18, %s2191_s8 }
 0x6f3   : > { %p1807_p10 = scmp.lt.u32.totalorder %s1805_s10, %s1801_s21  ;;  %p1809_p12 = scmp.lt.u32.totalorder %s1801_s21, %s2140_s18 }
 0x6f4   : > { %p1803_p7 = pnand %p1802_p4, %p1940_p5 }
 0x6f5   : > { %p1808_p11 = por %p1807_p10, %p1806_p9 }
 0x6f6   : > { %p1804_p8 = pneg %p1803_p7 }
 0x6f7   : > { %p1810_p13 = por %p1809_p12, %p1808_p11 }
 0x6f9   : > { %p1811_p0 = pnand %p1810_p13, %p1804_p8 }
 0x6fb   : > { %1814 = shalt.err (!%p1811_p0)
}
 0x6fc   : > { %1723 = dma.vmem_to_hbm [thread:$0]  (%p1940_p5), %s2142_s19, 128, %s2140_s18, %s1492_s20  }
 0x6fd PF: > { %p1729_p1 = scmp.ge.s32.totalorder %s1849_s30, 2  ;;  %s1517_s17 = sand.u32 1, %s1837_s27  }
 0x6fe   : > { %s1518_s23 = scalar_lea.sflag [#allocation3], %s1517_s17 }
 0x6ff   : > { %p1726_p2 = pnand %p1729_p1, %p1944_p6 }
 0x701   : > { %1832 = dma.done.wait (!%p1726_p2), %s1518_s23, 128  }
 0x702   : > { %1834 = vsyncadd (!%p1726_p2), %s1518_s23, 4294967168  ;;  %p18_p3 = scmp.ge.s32.totalorder %s1927_s11, 4   ;;  %s2194_s27 = smov %s1841_s28 }
 0x703   : > { %s2195_s28 = smov %s1845_s29  ;;  %s2196_s29 = smov %s1938_s14 }
 0x704   : > { %s2197_s30 = smov %s1927_s11  ;;  %20 = sbr.rel (!%p18_p3) target bundleno = 3 (0x3), region = 90 }
 0x70b   :  { %1523 = vsyncpa [#allocation3], 1 }
 0x70c   :  { %1525 = vsyncpa [#allocation3 + $0x1], 1 }

</bundles_post_ra>
